<compile_context>
chip_gen: v6e
topology: v6e:2x2x1
jax: 0.10.0
libtpu: 0.0.40
codegen_flags: <defaults>
</compile_context>

<pallas_src>
import jax
import jax.numpy as jnp
from jax.experimental import pallas as pl
from jax.experimental.pallas import tpu as pltpu

HIDDEN = 64
NUM_TASKS = 2


def _cdiv(a, b):
    return (a + b - 1) // b


def _round_up(n, m):
    return ((n + m - 1) // m) * m


def _vmem_capacity_bytes():
    """Per-core VMEM capacity; conservative fallback if query unavailable."""
    try:
        info = pltpu.get_tpu_info()
        cap = int(getattr(info, "vmem_capacity_bytes", 0))
        if cap > 0:
            return cap
    except Exception:
        pass
    return 64 << 20  # v7x per-TensorCore VMEM (most restrictive generation)


def _pick_tile_b(B, D, itemsize, vmem_limit):
    """Rows per grid step.

    Small batches: single full-extent tile (block == array dims is always a
    legal layout).  Large batches: sized against the VMEM budget (x is
    double-buffered), multiple of 128 so the (NUM_TASKS, tile_b) output block
    stays lane-aligned, and capped so there are >= 2 grid steps for megacore.
    """
    if B <= 256:
        return B
    row_bytes = max(1, D * itemsize)
    cap = (vmem_limit // 4) // (2 * row_bytes)   # ~1/4 of budget for x bufs
    cap = max(512, min(8192, cap))
    cap = (cap // 128) * 128
    two_steps = _round_up(_cdiv(B, 2), 128)      # guarantee >= 2 grid steps
    return max(128, min(cap, two_steps))


def _mtl_kernel(x_ref, ws_ref, bs_ref, w12t_ref, b12_ref, o_ref):
    # Shared layer: (TILE_B, D) @ (D, 64) -> (TILE_B, 64), f32 accumulate.
    shared = jnp.dot(x_ref[...], ws_ref[...],
                     preferred_element_type=jnp.float32) + bs_ref[...]
    shared = jnp.maximum(shared, 0.0)

    # Fused heads, lane-dense: (2, 64) . (TILE_B, 64)^T -> (2, TILE_B).
    heads = jax.lax.dot_general(
        w12t_ref[...], shared,
        dimension_numbers=(((1,), (1,)), ((), ())),
        preferred_element_type=jnp.float32) + b12_ref[...]

    # Row 0 -> task1 (sigmoid), row 1 -> task2 (linear).  Sigmoid runs on the
    # EUP (free slot); the select is a couple of fully packed VPU ops.
    row = jax.lax.broadcasted_iota(jnp.int32, heads.shape, 0)
    o_ref[...] = jnp.where(row == 0, jax.nn.sigmoid(heads), heads).astype(
        o_ref.dtype)


@jax.jit
def multi_task_forward(x, params):
    """MultiTaskModel forward.

    x: (B, input_dim) float32
    params: dict with Ws (D,64), bs (1,64), W1 (64,1), b1 (1,1), W2 (64,1),
            b2 (1,1), log_var_task1 (1,), log_var_task2 (1,)
    Returns (task1 (B,1), task2 (B,1), log_var_task1, log_var_task2).
    """
    B, D = x.shape

    # Fuse the two heads: (2, 64) weight, (2, 1) bias (lane-broadcastable).
    W12T = jnp.concatenate([params["W1"].T, params["W2"].T], axis=0)  # (2, 64)
    b12 = jnp.concatenate([params["b1"], params["b2"]], axis=0)       # (2, 1)

    vmem_cap = _vmem_capacity_bytes()
    vmem_limit = min((vmem_cap * 3) // 4, 128 << 20)
    tile_b = _pick_tile_b(B, D, x.dtype.itemsize, vmem_limit)
    grid = (_cdiv(B, tile_b),)

    cost = pl.CostEstimate(
        flops=2 * B * D * HIDDEN + 2 * B * HIDDEN * NUM_TASKS,
        transcendentals=B * NUM_TASKS,  # sigmoid
        bytes_accessed=(B * D + NUM_TASKS * B
                        + D * HIDDEN + HIDDEN
                        + HIDDEN * NUM_TASKS + NUM_TASKS) * 4,
    )

    out = pl.pallas_call(
        _mtl_kernel,
        out_shape=jax.ShapeDtypeStruct((NUM_TASKS, B), jnp.float32),
        grid=grid,
        in_specs=[
            # x: tiled over batch (ragged last tile handled by Pallas).
            pl.BlockSpec((tile_b, D), lambda i: (i, 0)),
            # Weights/biases: constant block index -> VMEM-resident.
            pl.BlockSpec((D, HIDDEN), lambda i: (0, 0)),
            pl.BlockSpec((1, HIDDEN), lambda i: (0, 0)),
            pl.BlockSpec((NUM_TASKS, HIDDEN), lambda i: (0, 0)),
            pl.BlockSpec((NUM_TASKS, 1), lambda i: (0, 0)),
        ],
        out_specs=pl.BlockSpec((NUM_TASKS, tile_b), lambda i: (0, i)),
        compiler_params=pltpu.CompilerParams(
            dimension_semantics=("parallel",),   # megacore-shardable on v7x
            vmem_limit_bytes=vmem_limit,
        ),
        cost_estimate=cost,
    )(x, params["Ws"], params["bs"], W12T, b12)

    task1 = out[0, :, None]   # (B, 1)
    task2 = out[1, :, None]   # (B, 1)
    return task1, task2, params["log_var_task1"], params["log_var_task2"]


def init_params(key, input_dim, hidden=HIDDEN):
    """Deterministic init mimicking nn.Linear's uniform(-1/sqrt(fan_in), ...)."""
    k1, k2, k3, k4, k5, k6 = jax.random.split(key, 6)
    bnd_s = 1.0 / jnp.sqrt(input_dim)
    bnd_h = 1.0 / jnp.sqrt(hidden)
    return {
        "Ws": jax.random.uniform(k1, (input_dim, hidden), jnp.float32, -bnd_s, bnd_s),
        "bs": jax.random.uniform(k2, (1, hidden), jnp.float32, -bnd_s, bnd_s),
        "W1": jax.random.uniform(k3, (hidden, 1), jnp.float32, -bnd_h, bnd_h),
        "b1": jax.random.uniform(k4, (1, 1), jnp.float32, -bnd_h, bnd_h),
        "W2": jax.random.uniform(k5, (hidden, 1), jnp.float32, -bnd_h, bnd_h),
        "b2": jax.random.uniform(k6, (1, 1), jnp.float32, -bnd_h, bnd_h),
        "log_var_task1": jnp.zeros((1,), jnp.float32),
        "log_var_task2": jnp.zeros((1,), jnp.float32),
    }


def _reference(x, p):
    shared = jnp.maximum(x @ p["Ws"] + p["bs"], 0.0)
    t1 = jax.nn.sigmoid(shared @ p["W1"] + p["b1"])
    t2 = shared @ p["W2"] + p["b2"]
    return t1, t2, p["log_var_task1"], p["log_var_task2"]


if __name__ == "__main__":
    key = jax.random.PRNGKey(0)
    kx, kp = jax.random.split(key)

    batch, input_dim = 8, 32
    x = jax.random.normal(kx, (batch, input_dim), jnp.float32)
    params = init_params(kp, input_dim)

    out = jax.block_until_ready(multi_task_forward(x, params))
    ref = _reference(x, params)
    assert all(
        jnp.allclose(a, b, atol=1e-5, rtol=1e-5) for a, b in zip(out, ref)
    ), "Pallas output mismatch vs. reference"
    assert out[0].shape == (batch, 1) and out[1].shape == (batch, 1)
    assert out[2].shape == (1,) and out[3].shape == (1,)

    # Multi-step grid with a ragged last tile (no padded copy of x).
    big_b = 2500
    xb = jax.random.normal(kx, (big_b, input_dim), jnp.float32)
    outb = jax.block_until_ready(multi_task_forward(xb, params))
    refb = _reference(xb, params)
    assert jnp.allclose(outb[0], refb[0], atol=1e-5, rtol=1e-5)
    assert jnp.allclose(outb[1], refb[1], atol=1e-5, rtol=1e-5)
    assert outb[0].shape == (big_b, 1) and outb[1].shape == (big_b, 1)

    print("KERNEL_OK")
</pallas_src>

<mosaic_0001>
module attributes {stable_mosaic.version = 11 : i64} {
  func.func @_mtl_kernel(%arg0: i32, %arg1: memref<8x32xf32, #tpu.memory_space<vmem>>, %arg2: memref<32x64xf32, #tpu.memory_space<vmem>>, %arg3: memref<1x64xf32, #tpu.memory_space<vmem>>, %arg4: memref<2x64xf32, #tpu.memory_space<vmem>>, %arg5: memref<2x1xf32, #tpu.memory_space<vmem>>, %arg6: memref<2x8xf32, #tpu.memory_space<vmem>>) attributes {dimension_semantics = [#tpu.dimension_semantics<parallel>], iteration_bounds = array<i64: 1>, scalar_prefetch = 0 : i64, scratch_operands = 0 : i64, tpu.core_type = #tpu.core_type<tc>, window_params = [{transform_indices = @transform_0, window_bounds = array<i64: 8, 32>}, {pipeline_mode = #tpu.pipeline_mode<synchronous>, transform_indices = @transform_1, window_bounds = array<i64: 32, 64>}, {pipeline_mode = #tpu.pipeline_mode<synchronous>, transform_indices = @transform_2, window_bounds = array<i64: 1, 64>}, {pipeline_mode = #tpu.pipeline_mode<synchronous>, transform_indices = @transform_3, window_bounds = array<i64: 2, 64>}, {pipeline_mode = #tpu.pipeline_mode<synchronous>, transform_indices = @transform_4, window_bounds = array<i64: 2, 1>}, {transform_indices = @transform_5, window_bounds = array<i64: 2, 8>}]} {
    %c0 = arith.constant 0 : index
    %c0_0 = arith.constant 0 : index
    %0 = vector.load %arg1[%c0, %c0_0] : memref<8x32xf32, #tpu.memory_space<vmem>>, vector<8x32xf32>
    %c0_1 = arith.constant 0 : index
    %c0_2 = arith.constant 0 : index
    %1 = vector.load %arg2[%c0_1, %c0_2] : memref<32x64xf32, #tpu.memory_space<vmem>>, vector<32x64xf32>
    %cst = arith.constant dense<0.000000e+00> : vector<8x64xf32>
    %2 = tpu.matmul %0, %1, %cst {dimension_numbers = #tpu.dot_dimension_numbers<[1], [0], [0], [1], [0, 0, 1, 1], [], []>} : vector<8x32xf32>, vector<32x64xf32>, vector<8x64xf32> -> vector<8x64xf32>
    %c0_3 = arith.constant 0 : index
    %c0_4 = arith.constant 0 : index
    %3 = vector.load %arg3[%c0_3, %c0_4] : memref<1x64xf32, #tpu.memory_space<vmem>>, vector<1x64xf32>
    %4 = vector.broadcast %3 : vector<1x64xf32> to vector<8x64xf32>
    %5 = arith.addf %2, %4 : vector<8x64xf32>
    %cst_5 = arith.constant 0.000000e+00 : f32
    %6 = vector.broadcast %cst_5 : f32 to vector<8x64xf32>
    %7 = arith.maximumf %5, %6 : vector<8x64xf32>
    %c0_6 = arith.constant 0 : index
    %c0_7 = arith.constant 0 : index
    %8 = vector.load %arg4[%c0_6, %c0_7] : memref<2x64xf32, #tpu.memory_space<vmem>>, vector<2x64xf32>
    %cst_8 = arith.constant dense<0.000000e+00> : vector<2x8xf32>
    %9 = tpu.matmul %8, %7, %cst_8 {dimension_numbers = #tpu.dot_dimension_numbers<[1], [1], [0], [0], [0, 0, 1, 0], [], []>} : vector<2x64xf32>, vector<8x64xf32>, vector<2x8xf32> -> vector<2x8xf32>
    %c0_9 = arith.constant 0 : index
    %c0_10 = arith.constant 0 : index
    %10 = vector.load %arg5[%c0_9, %c0_10] : memref<2x1xf32, #tpu.memory_space<vmem>>, vector<2x1xf32>
    %11 = vector.broadcast %10 : vector<2x1xf32> to vector<2x8xf32>
    %12 = arith.addf %9, %11 : vector<2x8xf32>
    %13 = tpu.iota {dimensions = array<i32: 0>} : vector<2x8xi32>
    %c0_i32 = arith.constant 0 : i32
    %14 = vector.broadcast %c0_i32 : i32 to vector<2x8xi32>
    %15 = arith.cmpi eq, %13, %14 : vector<2x8xi32>
    %16 = arith.negf %12 : vector<2x8xf32>
    %17 = math.exp %16 : vector<2x8xf32>
    %cst_11 = arith.constant 1.000000e+00 : f32
    %18 = vector.broadcast %cst_11 : f32 to vector<2x8xf32>
    %19 = arith.addf %18, %17 : vector<2x8xf32>
    %20 = arith.divf %18, %19 : vector<2x8xf32>
    %21 = arith.select %15, %20, %12 : vector<2x8xi1>, vector<2x8xf32>
    %c0_12 = arith.constant 0 : index
    %c0_13 = arith.constant 0 : index
    %22 = vector.load %arg6[%c0_12, %c0_13] : memref<2x8xf32, #tpu.memory_space<vmem>>, vector<2x8xf32>
    tpu.vector_store %arg6[%c0_12, %c0_13], %21 {strides = array<i32>} : memref<2x8xf32, #tpu.memory_space<vmem>>, vector<2x8xf32>,
    return
  }
  func.func @transform_0(%arg0: i32) -> (i32, i32) {
    %c0_i32 = arith.constant 0 : i32
    %c0_i32_0 = arith.constant 0 : i32
    return %arg0, %c0_i32 : i32, i32
  }
  func.func @transform_1(%arg0: i32) -> (i32, i32) {
    %c0_i32 = arith.constant 0 : i32
    %c0_i32_0 = arith.constant 0 : i32
    %c0_i32_1 = arith.constant 0 : i32
    return %c0_i32, %c0_i32_0 : i32, i32
  }
  func.func @transform_2(%arg0: i32) -> (i32, i32) {
    %c0_i32 = arith.constant 0 : i32
    %c0_i32_0 = arith.constant 0 : i32
    %c0_i32_1 = arith.constant 0 : i32
    return %c0_i32, %c0_i32_0 : i32, i32
  }
  func.func @transform_3(%arg0: i32) -> (i32, i32) {
    %c0_i32 = arith.constant 0 : i32
    %c0_i32_0 = arith.constant 0 : i32
    %c0_i32_1 = arith.constant 0 : i32
    return %c0_i32, %c0_i32_0 : i32, i32
  }
  func.func @transform_4(%arg0: i32) -> (i32, i32) {
    %c0_i32 = arith.constant 0 : i32
    %c0_i32_0 = arith.constant 0 : i32
    %c0_i32_1 = arith.constant 0 : i32
    return %c0_i32, %c0_i32_0 : i32, i32
  }
  func.func @transform_5(%arg0: i32) -> (i32, i32) {
    %c0_i32 = arith.constant 0 : i32
    %c0_i32_0 = arith.constant 0 : i32
    return %c0_i32, %arg0 : i32, i32
  }
}

</mosaic_0001>

<bundles_post_ra>
// kernel: multi_task_forward.1
= control target key start
LH: loop header
LB: loop body
LE: loop exit
PB: predicated region body
PF: predicated region fallthrough
CT: control target
= control target key end

     0   :  { %10 = vsyncpa [#allocation3], 0  ;;  %s283_s18 = smov [#allocation2]   ;;  %s337_s0 = inlined_call_operand.vmem [shape: f32[8,32], index: 0, kind: input, shape index: {}]   ;;  %s338_s1 = inlined_call_operand.hbm [shape: f32[32,64], index: 1, kind: input, shape index: {}]   ;;  %s339_s2 = inlined_call_operand.vmem [shape: f32[1,64], index: 2, kind: input, shape index: {}]   ;;  %s340_s3 = inlined_call_operand.vmem [shape: f32[2,64], index: 3, kind: input, shape index: {}]   ;;  %s341_s4 = inlined_call_operand.vmem [shape: f32[2,1], index: 4, kind: input, shape index: {}]   ;;  %s342_s5 = inlined_call_operand.vmem [shape: f32[2,8], index: 5, kind: output, shape index: {}]  }
   0x1   :  { %s18_s19 = sshll.u32 %s283_s18, 4  ;;  %s19_s19 = int_to_ptr.vmem [resolvable:$true] %s18_s19 }
   0x2   :  { %s269_s20 = scalar_lea.vmem %s19_s19, 512  ;;  %p274_p1 = scmp.lt.s32.totalorder %s19_s19, %s19_s19 }
   0x3   :  { %p270_p0 = scmp.ne.s32.totalorder %s19_s19, %s269_s20  ;;  %p275_p2 = scmp.lt.s32.totalorder %s269_s20, %s269_s20 }
   0x5   :  { %p276_p3 = por %p275_p2, %p274_p1 }
   0x7   :  { %p277_p4 = pnand %p276_p3, %p270_p0 }
   0x9   :  { %280 = shalt.err (!%p277_p4)
}
   0xa   :  { %s284_s21 = smov 128   ;;  %s285_s22 = smov 8  }
   0xb   :  { %24 = dma.hbm_to_vmem [thread:$0]  %s338_s1, 512, %s19_s19, [#allocation3], %s284_s21, %s284_s21, %s285_s22  }
   0xc   :  { %281 = dma.done.wait [#allocation3], 512  }
   0xd   :  { %282 = vsyncadd [#allocation3], 4294966784  ;;  %v286_v0 = vmov 0.0   ;;  %vm287_vm0 = vmmov 0   ;;  %v38_v1 = vld [vmem:[#allocation2 + $0x18] sm:$0xff]  ;;  %v37_v2 = vld [vmem:[#allocation2 + $0x10] sm:$0xff]  ;;  %v205_v21 = vlaneseq }
   0xe   :  { %234 = vmatprep.subr.mxu0 %v286_v0  ;;  %242 = vmatprep.mubr.msk.f32.mxu0 %vm287_vm0, %v286_v0  ;;  %v36_v3 = vld [vmem:[#allocation2 + $0x8] sm:$0xff]  ;;  %v35_v4 = vld [vmem:[#allocation2] sm:$0xff]  ;;  %vm46_vm1 = vcmask 261120   ;;  %v288_v7 = vmov 0   ;;  %vm128_vm2 = vcmask 523264   ;;  %vm215_vm4 = vcmask 58368  }
   0xf   :  { %245 = vmatprep.subr.mxu1 %v286_v0  ;;  %247 = vmatprep.mubr.msk.f32.mxu1 %vm287_vm0, %v286_v0  ;;  %v34_v5 = vld [vmem:[%s337_s0] sm:$0xff]  ;;  %v206_v22 = vshrl.u32 %v205_v21, 7 }
  0x10   :  { %235 = vmatpush3.msra.mxu0 %v38_v1  ;;  %v122_v6 = vld [vmem:[%s341_s4] sm:$0x3]  ;;  %256 = vset.pattern.permute.xlu0 %v288_v7 }
  0x11   :  { %236 = vmatprep.subr.mxu0 %v286_v0  ;;  %125 = vperm.xlu0 %256, %v122_v6   ;;  %v222_v8 = vld [vmem:[%s339_s2] ss:$0 sm:$0xff]  ;;  %vm207_vm3 = vcmp.eq.s32.totalorder %v206_v22, 0 }
  0x12   :  { %237 = vmatpush3.msra.mxu0 %v37_v2  ;;  %v121_v13 = vld [vmem:[%s340_s3] sm:$0x3] }
  0x13   :  { %238 = vmatprep.subr.mxu0 %v286_v0 }
  0x14   :  { %239 = vmatpush3.msra.mxu0 %v36_v3 }
  0x15   :  { %240 = vmatprep.subr.mxu0 %v286_v0 }
  0x16   :  { %241 = vmatpush3.msra.mxu0 %v35_v4 }
  0x17   :  { %243 = vmatmul.mubr.msk.f32.vlgmr.msra.gmra.mxu0 %vm46_vm1, %v34_v5 }
  0x8c   :  { %v126_v14 = vpop.permute.xlu0 %125 }
  0xd7   :  { %v116_v9 = vpop.f32.mrf.mxu0 }
  0xd8   :  { %v117_v10 = vadd.f32 %v222_v8, %v116_v9 }
  0xd9   :  { %v244_v11 = vpop.f32.mrf.mxu0 }
  0xda   :  { %v120_v12 = vmax.f32 %v117_v10, 0.0 }
  0xdc   :  { %246 = vmatpush3.xpose.msk.msra.mxu1 %vm128_vm2, %v120_v12 }
  0xdf   :  { %248 = vmatmul.mubr.msk.f32.vlgmr.msra.gmra.mxu1 %vm128_vm2, %v121_v13 }
 0x19f   :  { %v201_v15 = vpop.f32.mrf.mxu1 }
 0x1a0   :  { %v202_v16 = vadd.f32 %v201_v15, %v126_v14 }
 0x1a1   :  { %v249_v17 = vpop.f32.mrf.mxu1 }
 0x1a2   :  { %v226_v18 = vmul.f32 -1.442695, %v202_v16 }
 0x1a4   :  { %257 = vpow2.f32 %v226_v18 }
 0x1b1   :  { %v258_v19 = vpop.eup %257 }
 0x1b2   :  { %v211_v20 = vadd.f32 1.0, %v258_v19 }
 0x1b4   :  { %259 = vrcp.f32 %v211_v20 }
 0x1c1   :  { %v260_v23 = vpop.eup %259 }
 0x1c2   :  { %v214_v24 = vsel %vm207_vm3, %v260_v23, %v202_v16 }
 0x1c3   :  { %216 = vst.msk [vmem:[%s342_s5] sm:$0x3] %vm215_vm4, %v214_v24 }
 0x1c4   :  { %221 = vsyncpa [#allocation3], 1 }

</bundles_post_ra>
